<compile_context>
chip_gen: v5e
topology: v5e:2x2
jax: 0.10.0
libtpu: 0.0.40
codegen_flags: <defaults>
</compile_context>

<pallas_src>
import jax
import jax.numpy as jnp
from jax.experimental import pallas as pl
from jax.experimental.pallas import tpu as pltpu

DIM_X = 4
DIM_INPUT = DIM_X + 1  # 5

_MAX_BATCH_TILE = 2048                 # multiple of 8; ~1.6 MiB f32 output tile
_VMEM_LIMIT_BYTES = 32 * 1024 * 1024   # safe on v5e/v6e (128 MiB) and v7x (64 MiB)


def _batch_tile(batch):
    """Row-tile size.

    - batch <= 8: one full-array tile (always layout-legal).
    - batch  > 8: round_up(cdiv(batch, 2), 8), capped at _MAX_BATCH_TILE.
      This guarantees >= 2 grid steps so v7x megacore sharding engages, while
      keeping the tile a multiple of 8 (sublane requirement) and large enough
      to amortize the ~0.35 us per-grid-step overhead on v5e/v6e.
    """
    if batch <= 8:
        return batch
    half = -(-batch // 2)              # cdiv(batch, 2)
    tb = ((half + 7) // 8) * 8         # round up to a multiple of 8
    return min(tb, _MAX_BATCH_TILE)


def _pad_kernel(x_ref, o_ref):
    # ConstantPad1d((0, pad), 0).  Stores are split at the vreg-lane boundary
    # (128), not at column d_in: the first 128 lanes are composed in-register
    # and written with a single unmasked full-vreg store; only the tail
    # (lanes 128..n_out) is a (necessarily) masked store.
    d_in = x_ref.shape[-1]
    n_out = o_ref.shape[-1]
    rows = o_ref.shape[0]
    x = x_ref[...].astype(o_ref.dtype)

    if n_out > 128 and d_in < 128:
        head = jnp.concatenate(
            [x, jnp.zeros((rows, 128 - d_in), o_ref.dtype)], axis=-1)
        o_ref[:, :128] = head
        o_ref[:, 128:] = jnp.zeros((rows, n_out - 128), o_ref.dtype)
    else:
        # Narrow output: two non-overlapping stores at the data boundary.
        o_ref[:, :d_in] = x
        o_ref[:, d_in:] = jnp.zeros((rows, n_out - d_in), o_ref.dtype)


def _linear_kernel(x_ref, w_ref, b_ref, o_ref):
    # out = X @ W + B with K = 4 and N <= 5: far too small for the MXU.
    # 4 broadcast multiply-adds on the VPU (static trip count).
    x = x_ref[...].astype(jnp.float32)          # (TB, dim_X)
    w = w_ref[...].astype(jnp.float32)          # (dim_X, n_hid)
    b = b_ref[...].astype(jnp.float32)          # (1, n_hid)
    acc = jnp.broadcast_to(b, (x.shape[0], w.shape[1]))
    for k in range(w.shape[0]):
        acc = acc + x[:, k:k + 1] * w[k:k + 1, :]
    o_ref[...] = acc.astype(o_ref.dtype)


class PremodelPallas:
    """JAX/Pallas port of Premodel."""

    def __init__(self, n_hid):
        self.n_hid = n_hid
        self.dim_X = DIM_X
        self.dim_input = self.dim_X + 1
        # Deterministic init, exactly as in the PyTorch __init__ (zeros).
        self.pre_Weight = jnp.zeros((self.dim_X, self.n_hid), jnp.float32)
        self.pre_Bias = jnp.zeros((1, self.n_hid), jnp.float32)

    def __call__(self, X, use_pallas_linear=False):
        batch, d_in = X.shape
        tb = _batch_tile(batch)
        grid = (pl.cdiv(batch, tb),)
        cparams = pltpu.CompilerParams(
            dimension_semantics=("parallel",),
            vmem_limit_bytes=_VMEM_LIMIT_BYTES,
        )

        if self.n_hid > self.dim_input:
            # ConstantPad1d((0, n_hid - dim_input), 0):
            # output last dim = X.shape[-1] + (n_hid - dim_input).
            out_cols = d_in + (self.n_hid - self.dim_input)
            itemsize = jnp.dtype(X.dtype).itemsize
            cost = pl.CostEstimate(
                flops=0,
                transcendentals=0,
                bytes_accessed=batch * (d_in + out_cols) * itemsize,
            )
            return pl.pallas_call(
                _pad_kernel,
                out_shape=jax.ShapeDtypeStruct((batch, out_cols), X.dtype),
                grid=grid,
                in_specs=[pl.BlockSpec((tb, d_in), lambda i: (i, 0))],
                out_specs=pl.BlockSpec((tb, out_cols), lambda i: (i, 0)),
                compiler_params=cparams,
                cost_estimate=cost,
            )(X)

        # --- linear branch (n_hid <= dim_input) -----------------------------
        if not use_pallas_linear:
            # Per perf review: ~batch*40 FLOPs with 5/128 lane utilization is
            # not worth a kernel launch; let XLA fuse it with the caller.
            return (X @ self.pre_Weight + self.pre_Bias).astype(X.dtype)

        return pl.pallas_call(
            _linear_kernel,
            out_shape=jax.ShapeDtypeStruct((batch, self.n_hid), X.dtype),
            grid=grid,
            in_specs=[
                pl.BlockSpec((tb, d_in), lambda i: (i, 0)),
                # Constant block index -> weight/bias stay VMEM-resident
                # across all grid steps (no per-tile re-DMA).
                pl.BlockSpec((self.dim_X, self.n_hid), lambda i: (0, 0)),
                pl.BlockSpec((1, self.n_hid), lambda i: (0, 0)),
            ],
            out_specs=pl.BlockSpec((tb, self.n_hid), lambda i: (i, 0)),
            compiler_params=cparams,
        )(X, self.pre_Weight, self.pre_Bias)


if __name__ == "__main__":
    key = jax.random.PRNGKey(0)

    # --- primary configuration: n_hid = 200 (> dim_input) -> padding branch ---
    n_hid = 200
    model = PremodelPallas(n_hid)

    # Small batch (single tile).
    batch = 8
    X = jax.random.normal(key, (batch, model.dim_input), dtype=jnp.float32)
    out = jax.block_until_ready(model(X))
    ref = jnp.pad(X, ((0, 0), (0, n_hid - model.dim_input)))
    assert out.shape == (batch, n_hid), out.shape
    assert jnp.array_equal(out, ref), "pad branch mismatch (small batch)"

    # Multi-tile grid: batch=20 -> tb=16, grid=(2,), ragged last tile.
    # Exercises >=2-step megacore sharding and OOB-masked writes.
    batch_big = 20
    X_big = jax.random.normal(key, (batch_big, model.dim_input), dtype=jnp.float32)
    out_big = jax.block_until_ready(model(X_big))
    ref_big = jnp.pad(X_big, ((0, 0), (0, n_hid - model.dim_input)))
    assert out_big.shape == (batch_big, n_hid), out_big.shape
    assert jnp.array_equal(out_big, ref_big), "pad branch mismatch (tiled batch)"

    # --- linear branch (n_hid <= dim_input) -----------------------------------
    model2 = PremodelPallas(4)
    k_w, k_b, k_x = jax.random.split(jax.random.PRNGKey(1), 3)
    model2.pre_Weight = jax.random.normal(k_w, (DIM_X, 4), dtype=jnp.float32)
    model2.pre_Bias = jax.random.normal(k_b, (1, 4), dtype=jnp.float32)
    X2 = jax.random.normal(k_x, (batch, DIM_X), dtype=jnp.float32)
    ref2 = X2 @ model2.pre_Weight + model2.pre_Bias

    # Default path: plain XLA (perf-review recommendation).
    out2 = jax.block_until_ready(model2(X2))
    assert jnp.allclose(out2, ref2, atol=1e-5, rtol=1e-5), "linear (XLA) mismatch"

    # Optional Pallas VPU kernel, validated for parity.
    out2p = jax.block_until_ready(model2(X2, use_pallas_linear=True))
    assert jnp.allclose(out2p, ref2, atol=1e-5, rtol=1e-5), "linear (Pallas) mismatch"

    print("KERNEL_OK")
</pallas_src>

<mosaic_0001>
module attributes {stable_mosaic.version = 11 : i64} {
  func.func @_pad_kernel(%arg0: i32, %arg1: memref<8x5xf32, #tpu.memory_space<vmem>>, %arg2: memref<8x200xf32, #tpu.memory_space<vmem>>) attributes {dimension_semantics = [#tpu.dimension_semantics<parallel>], iteration_bounds = array<i64: 1>, scalar_prefetch = 0 : i64, scratch_operands = 0 : i64, tpu.core_type = #tpu.core_type<tc>, window_params = [{transform_indices = @transform_0, window_bounds = array<i64: 8, 5>}, {transform_indices = @transform_1, window_bounds = array<i64: 8, 200>}]} {
    %c0 = arith.constant 0 : index
    %c0_0 = arith.constant 0 : index
    %0 = vector.load %arg1[%c0, %c0_0] : memref<8x5xf32, #tpu.memory_space<vmem>>, vector<8x5xf32>
    %cst = arith.constant 0.000000e+00 : f32
    %1 = vector.broadcast %cst : f32 to vector<8x123xf32>
    %2 = tpu.concatenate %0, %1 in 1 : vector<8x5xf32>, vector<8x123xf32> -> vector<8x128xf32>
    %c0_1 = arith.constant 0 : index
    %c0_2 = arith.constant 0 : index
    %3 = vector.load %arg2[%c0_1, %c0_2] : memref<8x200xf32, #tpu.memory_space<vmem>>, vector<8x128xf32>
    tpu.vector_store %arg2[%c0_1, %c0_2], %2 {strides = array<i32>} : memref<8x200xf32, #tpu.memory_space<vmem>>, vector<8x128xf32>,
    %cst_3 = arith.constant 0.000000e+00 : f32
    %4 = vector.broadcast %cst_3 : f32 to vector<8x72xf32>
    %c0_4 = arith.constant 0 : index
    %c128 = arith.constant 128 : index
    %5 = vector.load %arg2[%c0_4, %c128] : memref<8x200xf32, #tpu.memory_space<vmem>>, vector<8x72xf32>
    tpu.vector_store %arg2[%c0_4, %c128], %4 {strides = array<i32>} : memref<8x200xf32, #tpu.memory_space<vmem>>, vector<8x72xf32>,
    return
  }
  func.func @transform_0(%arg0: i32) -> (i32, i32) {
    %c0_i32 = arith.constant 0 : i32
    %c0_i32_0 = arith.constant 0 : i32
    return %arg0, %c0_i32 : i32, i32
  }
  func.func @transform_1(%arg0: i32) -> (i32, i32) {
    %c0_i32 = arith.constant 0 : i32
    %c0_i32_0 = arith.constant 0 : i32
    return %arg0, %c0_i32 : i32, i32
  }
}

</mosaic_0001>

<bundles_post_ra>
// kernel: tpu_custom_call.1
= control target key start
LH: loop header
LB: loop body
LE: loop exit
PB: predicated region body
PF: predicated region fallthrough
CT: control target
= control target key end

     0   :  { %6 = vsyncpa [#allocation3], 0  ;;  %s120_s0 = inlined_call_operand.hbm [shape: f32[8,5], index: 0, kind: input, shape index: {}]   ;;  %s121_s1 = inlined_call_operand.hbm [shape: f32[8,200], index: 1, kind: output, shape index: {}]  }
   0x1   :  { %7 = vsyncpa [#allocation4], 0  ;;  %s13_s8 = sshll.u32 %s120_s0, 4  ;;  %s101_s9 = smov [#allocation2]   ;;  %s14_s8 = int_to_ptr.hbm [resolvable:$true] %s13_s8 }
   0x2   :  { %s15_s10 = sshll.u32 %s101_s9, 4  ;;  %s16_s10 = int_to_ptr.vmem [resolvable:$true] %s15_s10 }
   0x3   :  { %18 = dma.hbm_to_vmem [thread:$0]  %s14_s8, 128, %s16_s10, [#allocation3]  }
   0x4   :  { %97 = dma.done.wait [#allocation3], 128  }
   0x5   :  { %98 = vsyncadd [#allocation3], 4294967168  ;;  %vm27_vm0 = vcmask 588800   ;;  %v102_v0 = vmov 0.0   ;;  %s103_s11 = smov [#allocation5]   ;;  %s36_s15 = sshll.u32 %s121_s1, 4  ;;  %s37_s15 = int_to_ptr.hbm [resolvable:$true] %s36_s15 }
   0x6   :  { %28 = vst.msk [vmem:[#allocation5 + $0x8] sm:$0xff] %vm27_vm0, %v102_v0  ;;  %s34_s12 = sshll.u32 %s103_s11, 4  ;;  %vm24_vm1 = vcmask 39936   ;;  %v23_v1 = vld [vmem:[#allocation2] sm:$0xff]  ;;  %s35_s12 = int_to_ptr.vmem [resolvable:$true] %s34_s12 }
   0x7   :  { %v25_v2 = vsel %vm24_vm1, %v23_v1, 0.0 }
   0x8   :  { %26 = vst [vmem:[#allocation5] sm:$0xff] %v25_v2 }
   0x9   :  { %39 = dma.vmem_to_hbm [thread:$0]  %s35_s12, 256, %s37_s15, [#allocation4]  }
   0xa   :  { %99 = dma.done.wait [#allocation4], 256  }
   0xb   :  { %100 = vsyncadd [#allocation4], 4294967040 }
   0xc   :  { %44 = vsyncpa [#allocation3], 1 }
   0xd   :  { %45 = vsyncpa [#allocation4], 1 }

</bundles_post_ra>
